<compile_context>
chip_gen: v5e
topology: v5e:2x2
jax: 0.10.0
libtpu: 0.0.40
codegen_flags: <defaults>
</compile_context>

<pallas_src>
import functools

import jax
import jax.numpy as jnp
from jax.experimental import pallas as pl
from jax.experimental.pallas import tpu as pltpu


def _build_adv_loss_call(label: int, batch: int, num_classes: int, dtype_name: str):
    """Builds a pallas_call specialized on the static original label."""
    label = int(label)
    other = int(not label)  # matches torch: int(not orig_label)

    def adv_loss_kernel(logits_ref, kappa_ref, out_ref):
        # logits_ref: VMEM (B, C)   -- full logits array, no wrapper slicing
        # kappa_ref : SMEM (1,) f32 -- confidence margin (scalar)
        # out_ref   : VMEM (1, 1) f32
        row = logits_ref[0:1, :].astype(jnp.float32)                 # (1, C) single vector load
        diff = row[:, label:label + 1] - row[:, other:other + 1]     # (1, 1) static lane slices
        out_ref[...] = jnp.maximum(diff, -kappa_ref[0])              # scalar broadcast from SMEM

    return pl.pallas_call(
        adv_loss_kernel,
        out_shape=jax.ShapeDtypeStruct((1, 1), jnp.float32),
        in_specs=[
            pl.BlockSpec(memory_space=pltpu.MemorySpace.VMEM),  # logits -> VMEM (whole, tiny)
            pl.BlockSpec(memory_space=pltpu.MemorySpace.SMEM),  # kappa  -> SMEM scalar
        ],
        out_specs=pl.BlockSpec(memory_space=pltpu.MemorySpace.VMEM),
    )


@functools.lru_cache(maxsize=None)
def _cached_adv_loss_call(label: int, batch: int, num_classes: int, dtype_name: str):
    return _build_adv_loss_call(label, batch, num_classes, dtype_name)


def adversarial_loss(logits: jax.Array, orig_label: int, kappa) -> jax.Array:
    """Pallas implementation of AdversarialLoss.forward.

    logits: (B, C) array (only row 0 participates, matching logits[0][...]).
    orig_label: static Python int (binary labels, matching `int(not orig_label)`).
    kappa: scalar / 0-d array.
    Returns a scalar jnp.float32.
    """
    b, c = logits.shape
    label = int(orig_label)
    assert 0 <= label < c, "orig_label must index a valid class"
    # NOTE: `int(not orig_label)` only makes sense for binary labels {0, 1},
    # exactly as in the original PyTorch module.

    fn = _cached_adv_loss_call(label, b, c, str(logits.dtype))
    kappa_arr = jnp.asarray(kappa, dtype=jnp.float32).reshape(1)  # SMEM wants rank-1
    out = fn(logits, kappa_arr)
    return out[0, 0]


if __name__ == "__main__":
    key = jax.random.PRNGKey(0)

    # Binary-classification logits, batch of 2 (only row 0 participates,
    # exactly like logits[0][...] in the PyTorch module).
    logits = jax.random.normal(key, (2, 2), dtype=jnp.float32)
    orig_label = 1
    kappa = jnp.float32(0.1)

    result = adversarial_loss(logits, orig_label, kappa)
    result = jax.block_until_ready(result)

    # Pure-JAX reference check of the forward semantics.
    ref = jnp.maximum(
        logits[0, orig_label] - logits[0, int(not orig_label)], -1.0 * kappa
    )
    assert jnp.allclose(result, ref, atol=1e-6), (result, ref)

    print("KERNEL_OK")
</pallas_src>

<mosaic_0001>
module attributes {stable_mosaic.version = 11 : i64} {
  func.func @adv_loss_kernel(%arg0: memref<2x2xf32, #tpu.memory_space<vmem>>, %arg1: memref<1xf32, #tpu.memory_space<smem>>, %arg2: memref<1x1xf32, #tpu.memory_space<vmem>>) attributes {dimension_semantics = [], scalar_prefetch = 0 : i64, scratch_operands = 0 : i64, tpu.core_type = #tpu.core_type<tc>} {
    %c0 = arith.constant 0 : index
    %c0_0 = arith.constant 0 : index
    %0 = vector.load %arg0[%c0, %c0_0] : memref<2x2xf32, #tpu.memory_space<vmem>>, vector<1x2xf32>
    %1 = vector.extract_strided_slice %0 {offsets = [0, 1], sizes = [1, 1], strides = [1, 1]} : vector<1x2xf32> to vector<1x1xf32>
    %2 = vector.extract_strided_slice %0 {offsets = [0, 0], sizes = [1, 1], strides = [1, 1]} : vector<1x2xf32> to vector<1x1xf32>
    %3 = arith.subf %1, %2 : vector<1x1xf32>
    %c0_1 = arith.constant 0 : index
    %4 = memref.load %arg1[%c0_1] : memref<1xf32, #tpu.memory_space<smem>>
    %cst = arith.constant 0.000000e+00 : f32
    %5 = arith.subf %cst, %4 : f32
    %6 = vector.broadcast %5 : f32 to vector<1x1xf32>
    %7 = arith.maximumf %3, %6 : vector<1x1xf32>
    %c0_2 = arith.constant 0 : index
    %c0_3 = arith.constant 0 : index
    %8 = vector.load %arg2[%c0_2, %c0_3] : memref<1x1xf32, #tpu.memory_space<vmem>>, vector<1x1xf32>
    tpu.vector_store %arg2[%c0_2, %c0_3], %7 {strides = array<i32>} : memref<1x1xf32, #tpu.memory_space<vmem>>, vector<1x1xf32>,
    return
  }
}

</mosaic_0001>

<bundles_post_ra>
// kernel: tpu_custom_call.1
= control target key start
LH: loop header
LB: loop body
LE: loop exit
PB: predicated region body
PF: predicated region fallthrough
CT: control target
= control target key end

     0   :  { %s101_s0 = inlined_call_operand.vmem [shape: f32[2,2], index: 0, kind: input, shape index: {}]   ;;  %s102_s1 = inlined_call_operand.<no memory space> [shape: f32[1], index: 1, kind: input, shape index: {}]   ;;  %s103_s2 = inlined_call_operand.hbm [shape: f32[1,1], index: 2, kind: output, shape index: {}]  }
   0x1   :  { %v13_v0 = vld [vmem:[%s101_s0] sm:$0x1] }
   0x2   :  { %8 = vsyncpa [#allocation4], 0  ;;  %s74_s11 = smov 1   ;;  %s20_s14 = ssub.f32 0.0, %s102_s1  ;;  %vm27_vm0 = vcmask 0  }
   0x3   :  { %15 = vrot.lane.b32.xlu0 %v13_v0, %s74_s11  ;;  %s75_s15 = smov 127   ;;  %s76_s16 = smov [#allocation3]  }
   0x4   :  { %v21_v1 = vstv %s20_s14  ;;  %s34_s17 = sshll.u32 %s76_s16, 4  ;;  %s36_s20 = sshll.u32 %s103_s2, 4  ;;  %s35_s17 = int_to_ptr.vmem [resolvable:$true] %s34_s17  ;;  %s37_s20 = int_to_ptr.hbm [resolvable:$true] %s36_s20 }
  0x75   :  { %v16_v2 = vpop.permute.xlu0 %15 }
  0x76   :  { %v18_v3 = vsub.f32 %v13_v0, %v16_v2 }
  0x78   :  { %v22_v4 = vmax.f32 %v18_v3, %v21_v1 }
  0x7a   :  { %24 = vrot.lane.b32.xlu0 %v22_v4, %s75_s15 }
  0xec   :  { %v25_v5 = vpop.permute.xlu0 %24 }
  0xed   :  { %28 = vst.msk [vmem:[#allocation3] sm:$0x1] %vm27_vm0, %v25_v5 }
  0xee   :  { %39 = dma.vmem_to_hbm [thread:$0]  %s35_s17, 16, %s37_s20, [#allocation4]  }
  0xef   :  { %72 = dma.done.wait [#allocation4], 16  }
  0xf0   :  { %73 = vsyncadd [#allocation4], 4294967280 }
  0xf1   :  { %44 = vsyncpa [#allocation4], 1 }

</bundles_post_ra>
